<compile_context>
chip_gen: v6e
topology: v6e:2x2x1
jax: 0.10.0
libtpu: 0.0.40
codegen_flags: <defaults>
</compile_context>

<pallas_src>
import functools

import jax
import jax.numpy as jnp
from jax.experimental import pallas as pl
from jax.experimental.pallas import tpu as pltpu


def _policy_kernel(x_ref, w1t_ref, wht_ref, out_ref, *,
                   state_dim, hidden_dim, action_dim):
    # x block: (tb, S).  Cast per block (hidden under DMA); no wrapper-side cast pass.
    w1t = w1t_ref[...]                                   # (H, S+1) = [W1^T | b1]
    wht = wht_ref[...]                                   # (2A, H+1) = [[Wmu^T;Wstd^T] | [bmu;bstd]]
    x = x_ref[...].astype(w1t.dtype)                     # (tb, S)

    w1 = w1t[:, :state_dim]                              # (H, S)
    b1 = w1t[:, state_dim:state_dim + 1].astype(jnp.float32)   # (H, 1)

    # h^T = W1^T . x^T  computed as A @ B^T via dot_general (contract both last dims),
    # so batch lands on the lane axis without materializing a transpose of x.
    hT = jax.lax.dot_general(w1, x, (((1,), (1,)), ((), ())),
                             preferred_element_type=jnp.float32)      # (H, tb)
    hT = jnp.maximum(hT + b1, 0.0)                        # relu, lane-dense

    wh = wht[:, :hidden_dim]                              # (2A, H)
    bh = wht[:, hidden_dim:hidden_dim + 1].astype(jnp.float32)  # (2A, 1)
    zT = jnp.dot(wh, hT.astype(wh.dtype),
                 preferred_element_type=jnp.float32) + bh            # (2A, tb)

    # Rows [0:A] -> mu head, rows [A:2A] -> std head.  Both activations over the full
    # lane-dense block (EUP work), selected per sublane row.
    mu_full = 2.0 * jnp.tanh(zT)
    std_full = jnp.maximum(zT, 0.0) + jnp.log1p(jnp.exp(-jnp.abs(zT)))  # stable softplus
    row = jax.lax.broadcasted_iota(jnp.int32, zT.shape, dimension=0)
    out_ref[...] = jnp.where(row < action_dim, mu_full, std_full).astype(out_ref.dtype)


def pack_params(params, *, compute_dtype=jnp.float32):
    """One-time packing (call OUTSIDE the per-step hot path).

    params: (in, out)-layout weights + (1, out) biases (PyTorch weights transposed).
    Returns packed slabs:
      w1t : (H, S+1)  = [W1^T | b1^T]
      wht : (2A, H+1) = [[Wmu^T ; Wstd^T] | [bmu^T ; bstd^T]]
    compute_dtype=jnp.bfloat16 is worthwhile on v6e/v7x at large batch; keep float32 on
    v5e and whenever exact parity with the PyTorch reference is required.
    """
    w1t = jnp.concatenate([params["w1"].T, params["b1"].T], axis=1).astype(compute_dtype)
    whT = jnp.concatenate([params["wmu"].T, params["wstd"].T], axis=0)
    bhT = jnp.concatenate([params["bmu"].T, params["bstd"].T], axis=0)
    wht = jnp.concatenate([whT, bhT], axis=1).astype(compute_dtype)
    return {"w1t": w1t, "wht": wht}


def policy_net_continuous(x, packed, *, block_batch=4096, xla_fallback_batch=0):
    """x: (B, state_dim) float32.  packed: output of pack_params().

    Returns (mu, std), each (B, action_dim) float32.
    """
    B, S = x.shape
    H, sp1 = packed["w1t"].shape
    A2, hp1 = packed["wht"].shape
    assert sp1 == S + 1 and hp1 == H + 1 and A2 % 2 == 0
    A = A2 // 2

    # Tiny-batch path: pallas_call dispatch overhead dwarfs the work below this size.
    if B < xla_fallback_batch:
        w1t, wht = packed["w1t"].astype(jnp.float32), packed["wht"].astype(jnp.float32)
        h = jax.nn.relu(x @ w1t[:, :S].T + w1t[:, S])
        z = h @ wht[:, :H].T + wht[:, H]
        return 2.0 * jnp.tanh(z[:, :A]), jax.nn.softplus(z[:, A:])

    # Batch tile: full batch when it fits, else a multiple of 128 so the lane-dense
    # output block and the (tb, S) input block satisfy the (8, 128) constraint.
    if B <= block_batch:
        tb = B
    else:
        tb = max(128, (block_batch // 128) * 128)
    grid = (pl.cdiv(B, tb),)

    kernel = functools.partial(
        _policy_kernel, state_dim=S, hidden_dim=H, action_dim=A)

    # VMEM budget (double-buffered x + out blocks, lane/sublane-padded), with headroom
    # but capped below v7x's 64 MiB physical VMEM.
    x_itemsize = jnp.dtype(x.dtype).itemsize
    lanes = max(128, ((S + 127) // 128) * 128)
    x_block_bytes = tb * lanes * x_itemsize               # (tb, S) lane-padded
    out_block_bytes = max(8, A2) * tb * 4                 # (2A, tb) sublane-padded, f32
    vmem_limit = int(2 * (x_block_bytes + out_block_bytes) + (4 << 20))
    vmem_limit = min(max(vmem_limit, 16 << 20), 48 << 20)

    w_itemsize = jnp.dtype(packed["w1t"].dtype).itemsize
    cost = pl.CostEstimate(
        flops=2 * B * (S * H + H * 2 * A),
        transcendentals=4 * B * A,
        bytes_accessed=(x.size * x_itemsize
                        + (packed["w1t"].size + packed["wht"].size) * w_itemsize
                        + B * 2 * A * 4),
    )

    out = pl.pallas_call(
        kernel,
        out_shape=jax.ShapeDtypeStruct((2 * A, B), jnp.float32),
        grid=grid,
        in_specs=[
            pl.BlockSpec((tb, S), lambda i: (i, 0)),           # x streamed over batch
            pl.BlockSpec((H, S + 1), lambda i: (0, 0)),        # packed layer-1 weights (resident)
            pl.BlockSpec((2 * A, H + 1), lambda i: (0, 0)),    # packed fused-head weights (resident)
        ],
        out_specs=pl.BlockSpec((2 * A, tb), lambda i: (0, i)), # lane-dense output block
        compiler_params=pltpu.CompilerParams(
            dimension_semantics=("parallel",),
            vmem_limit_bytes=vmem_limit),
        cost_estimate=cost,
    )(x, packed["w1t"], packed["wht"])

    # Split heads by rows; transpose back to (B, A) — tiny arrays, negligible cost.
    mu = out[:A, :].T
    std = out[A:, :].T
    return mu, std


def init_params(key, state_dim, hidden_dim, action_dim):
    """Deterministic init mimicking torch.nn.Linear's U(-1/sqrt(fan_in), 1/sqrt(fan_in)).
    Weights stored (in_features, out_features) — i.e. PyTorch weight transposed."""
    ks = jax.random.split(key, 6)

    def lin(kw, kb, fan_in, fan_out):
        bound = 1.0 / jnp.sqrt(fan_in)
        w = jax.random.uniform(kw, (fan_in, fan_out), jnp.float32, -bound, bound)
        b = jax.random.uniform(kb, (1, fan_out), jnp.float32, -bound, bound)
        return w, b

    w1, b1 = lin(ks[0], ks[1], state_dim, hidden_dim)
    wmu, bmu = lin(ks[2], ks[3], hidden_dim, action_dim)
    wstd, bstd = lin(ks[4], ks[5], hidden_dim, action_dim)
    return {"w1": w1, "b1": b1, "wmu": wmu, "bmu": bmu, "wstd": wstd, "bstd": bstd}


def _reference(x, p):
    h = jax.nn.relu(x @ p["w1"] + p["b1"])
    mu = 2.0 * jnp.tanh(h @ p["wmu"] + p["bmu"])
    std = jax.nn.softplus(h @ p["wstd"] + p["bstd"])
    return mu, std


if __name__ == "__main__":
    # Pendulum-like small shapes: batch=8, state_dim=4, hidden=32, action_dim=2
    B, STATE_DIM, HIDDEN_DIM, ACTION_DIM = 8, 4, 32, 2

    key = jax.random.PRNGKey(0)
    kx, kp = jax.random.split(key)
    x = jax.random.normal(kx, (B, STATE_DIM), dtype=jnp.float32)
    params = init_params(kp, STATE_DIM, HIDDEN_DIM, ACTION_DIM)

    packed = pack_params(params)                     # one-time packing (not per-call)
    mu, std = policy_net_continuous(x, packed)
    mu, std = jax.block_until_ready(mu), jax.block_until_ready(std)

    mu_ref, std_ref = _reference(x, params)
    assert mu.shape == (B, ACTION_DIM) and std.shape == (B, ACTION_DIM)
    assert jnp.allclose(mu, mu_ref, atol=1e-5, rtol=1e-5), "mu mismatch"
    assert jnp.allclose(std, std_ref, atol=1e-5, rtol=1e-5), "std mismatch"

    print("KERNEL_OK")
</pallas_src>

<mosaic_0001>
module attributes {stable_mosaic.version = 11 : i64} {
  func.func @_policy_kernel(%arg0: i32, %arg1: memref<8x4xf32, #tpu.memory_space<vmem>>, %arg2: memref<32x5xf32, #tpu.memory_space<vmem>>, %arg3: memref<4x33xf32, #tpu.memory_space<vmem>>, %arg4: memref<4x8xf32, #tpu.memory_space<vmem>>) attributes {dimension_semantics = [#tpu.dimension_semantics<parallel>], iteration_bounds = array<i64: 1>, scalar_prefetch = 0 : i64, scratch_operands = 0 : i64, tpu.core_type = #tpu.core_type<tc>, window_params = [{transform_indices = @transform_0, window_bounds = array<i64: 8, 4>}, {pipeline_mode = #tpu.pipeline_mode<synchronous>, transform_indices = @transform_1, window_bounds = array<i64: 32, 5>}, {pipeline_mode = #tpu.pipeline_mode<synchronous>, transform_indices = @transform_2, window_bounds = array<i64: 4, 33>}, {transform_indices = @transform_3, window_bounds = array<i64: 4, 8>}]} {
    %c0 = arith.constant 0 : index
    %c0_0 = arith.constant 0 : index
    %0 = vector.load %arg2[%c0, %c0_0] : memref<32x5xf32, #tpu.memory_space<vmem>>, vector<32x5xf32>
    %c0_1 = arith.constant 0 : index
    %c0_2 = arith.constant 0 : index
    %1 = vector.load %arg3[%c0_1, %c0_2] : memref<4x33xf32, #tpu.memory_space<vmem>>, vector<4x33xf32>
    %c0_3 = arith.constant 0 : index
    %c0_4 = arith.constant 0 : index
    %2 = vector.load %arg1[%c0_3, %c0_4] : memref<8x4xf32, #tpu.memory_space<vmem>>, vector<8x4xf32>
    %3 = vector.extract_strided_slice %0 {offsets = [0, 0], sizes = [32, 4], strides = [1, 1]} : vector<32x5xf32> to vector<32x4xf32>
    %4 = vector.extract_strided_slice %0 {offsets = [0, 4], sizes = [32, 1], strides = [1, 1]} : vector<32x5xf32> to vector<32x1xf32>
    %cst = arith.constant dense<0.000000e+00> : vector<32x8xf32>
    %5 = tpu.matmul %3, %2, %cst {dimension_numbers = #tpu.dot_dimension_numbers<[1], [1], [0], [0], [0, 0, 1, 0], [], []>} : vector<32x4xf32>, vector<8x4xf32>, vector<32x8xf32> -> vector<32x8xf32>
    %6 = vector.broadcast %4 : vector<32x1xf32> to vector<32x8xf32>
    %7 = arith.addf %5, %6 : vector<32x8xf32>
    %cst_5 = arith.constant 0.000000e+00 : f32
    %8 = vector.broadcast %cst_5 : f32 to vector<32x8xf32>
    %9 = arith.maximumf %7, %8 : vector<32x8xf32>
    %10 = vector.extract_strided_slice %1 {offsets = [0, 0], sizes = [4, 32], strides = [1, 1]} : vector<4x33xf32> to vector<4x32xf32>
    %11 = vector.extract_strided_slice %1 {offsets = [0, 32], sizes = [4, 1], strides = [1, 1]} : vector<4x33xf32> to vector<4x1xf32>
    %cst_6 = arith.constant dense<0.000000e+00> : vector<4x8xf32>
    %12 = tpu.matmul %10, %9, %cst_6 {dimension_numbers = #tpu.dot_dimension_numbers<[1], [0], [0], [1], [0, 0, 1, 1], [], []>} : vector<4x32xf32>, vector<32x8xf32>, vector<4x8xf32> -> vector<4x8xf32>
    %13 = vector.broadcast %11 : vector<4x1xf32> to vector<4x8xf32>
    %14 = arith.addf %12, %13 : vector<4x8xf32>
    %15 = math.tanh %14 : vector<4x8xf32>
    %cst_7 = arith.constant 2.000000e+00 : f32
    %16 = vector.broadcast %cst_7 : f32 to vector<4x8xf32>
    %17 = arith.mulf %16, %15 : vector<4x8xf32>
    %cst_8 = arith.constant 0.000000e+00 : f32
    %18 = vector.broadcast %cst_8 : f32 to vector<4x8xf32>
    %19 = arith.maximumf %14, %18 : vector<4x8xf32>
    %20 = math.absf %14 : vector<4x8xf32>
    %cst_9 = arith.constant 0.000000e+00 : f32
    %21 = vector.broadcast %cst_9 : f32 to vector<4x8xf32>
    %22 = arith.subf %21, %20 : vector<4x8xf32>
    %23 = math.exp %22 : vector<4x8xf32>
    %24 = math.log1p %23 : vector<4x8xf32>
    %25 = arith.addf %19, %24 : vector<4x8xf32>
    %26 = tpu.iota {dimensions = array<i32: 0>} : vector<4x8xi32>
    %c2_i32 = arith.constant 2 : i32
    %27 = vector.broadcast %c2_i32 : i32 to vector<4x8xi32>
    %28 = arith.cmpi slt, %26, %27 : vector<4x8xi32>
    %29 = arith.select %28, %17, %25 : vector<4x8xi1>, vector<4x8xf32>
    %c0_10 = arith.constant 0 : index
    %c0_11 = arith.constant 0 : index
    %30 = vector.load %arg4[%c0_10, %c0_11] : memref<4x8xf32, #tpu.memory_space<vmem>>, vector<4x8xf32>
    tpu.vector_store %arg4[%c0_10, %c0_11], %29 {strides = array<i32>} : memref<4x8xf32, #tpu.memory_space<vmem>>, vector<4x8xf32>,
    return
  }
  func.func @transform_0(%arg0: i32) -> (i32, i32) {
    %c0_i32 = arith.constant 0 : i32
    %c0_i32_0 = arith.constant 0 : i32
    return %arg0, %c0_i32 : i32, i32
  }
  func.func @transform_1(%arg0: i32) -> (i32, i32) {
    %c0_i32 = arith.constant 0 : i32
    %c0_i32_0 = arith.constant 0 : i32
    %c0_i32_1 = arith.constant 0 : i32
    return %c0_i32, %c0_i32_0 : i32, i32
  }
  func.func @transform_2(%arg0: i32) -> (i32, i32) {
    %c0_i32 = arith.constant 0 : i32
    %c0_i32_0 = arith.constant 0 : i32
    %c0_i32_1 = arith.constant 0 : i32
    return %c0_i32, %c0_i32_0 : i32, i32
  }
  func.func @transform_3(%arg0: i32) -> (i32, i32) {
    %c0_i32 = arith.constant 0 : i32
    %c0_i32_0 = arith.constant 0 : i32
    return %c0_i32, %arg0 : i32, i32
  }
}

</mosaic_0001>

<bundles_post_ra>
// kernel: tpu_custom_call.1
= control target key start
LH: loop header
LB: loop body
LE: loop exit
PB: predicated region body
PF: predicated region fallthrough
CT: control target
= control target key end

     0   :  { %vm41_vm0 = vcmask 31744   ;;  %s380_s0 = inlined_call_operand.vmem [shape: f32[8,4], index: 0, kind: input, shape index: {}]   ;;  %s381_s1 = inlined_call_operand.vmem [shape: f32[32,5], index: 1, kind: input, shape index: {}]   ;;  %s382_s2 = inlined_call_operand.vmem [shape: f32[4,33], index: 2, kind: input, shape index: {}]   ;;  %s383_s3 = inlined_call_operand.hbm [shape: f32[4,8], index: 3, kind: output, shape index: {}]  }
   0x1   :  { %v20_v0 = vld [vmem:[%s380_s0] sm:$0xff] }
   0x2   :  { %v15_v1 = vld [vmem:[%s381_s1] sm:$0xff]  ;;  %273 = vmatprep.subr.msk.mxu0 %vm41_vm0, %v20_v0 }
   0x3   :  { %275 = vmatprep.mubr.msk.f32.mxu0 %vm41_vm0, %v15_v1 }
   0x4   :  { %8 = vsyncpa [#allocation3], 0  ;;  %274 = vmatpush3.xpose.msk.msra.mxu0 %vm41_vm0, %v20_v0  ;;  %v16_v2 = vld [vmem:[%s381_s1 + $0x8] sm:$0xff]  ;;  %v328_v3 = vmov 4   ;;  %v17_v4 = vld [vmem:[%s381_s1 + $0x10] sm:$0xff]  ;;  %v329_v6 = vmov 0.0   ;;  %v237_v35 = vlaneseq }
   0x5   :  { %298 = vset.pattern.permute.xlu1 %v328_v3  ;;  %v18_v5 = vld [vmem:[%s381_s1 + $0x18] sm:$0xff]  ;;  %297 = vset.pattern.permute.xlu0 %v328_v3  ;;  %vm330_vm1 = vmmov 0   ;;  %v19_v7 = vld [vmem:[%s382_s2] sm:$0xf]  ;;  %v331_v8 = vmov 32   ;;  %vm147_vm2 = vcmask 261120  }
   0x6   :  { %28 = vperm.xlu1 %298, %v16_v2   ;;  %38 = vperm.xlu0 %297, %v18_v5   ;;  %v238_v38 = vshrl.u32 %v237_v35, 7  ;;  %s332_s1 = smov [#allocation2]   ;;  %vm241_vm5 = vcmask 60416  }
   0x7   :  { %276 = vmatmul.mubr.msk.f32.vlgmr.msra.gmra.mxu0 %vm41_vm0, %v16_v2  ;;  %281 = vmatprep.subr.mxu1 %v329_v6  ;;  %s249_s2 = sshll.u32 %s332_s1, 4  ;;  %s250_s2 = int_to_ptr.vmem [resolvable:$true] %s249_s2 }
   0x8   :  { %278 = vmatprep.mubr.msk.f32.mxu0 %vm41_vm0, %v17_v4  ;;  %289 = vmatprep.mubr.msk.f32.mxu1 %vm330_vm1, %v329_v6  ;;  %vm239_vm4 = vcmp.lt.s32.totalorder %v238_v38, 2  ;;  %s306_s23 = scalar_lea.vmem %s250_s2, 64  ;;  %p311_p1 = scmp.lt.s32.totalorder %s250_s2, %s250_s2 }
   0x9   :  { %p307_p0 = scmp.ne.s32.totalorder %s250_s2, %s306_s23  ;;  %p312_p2 = scmp.lt.s32.totalorder %s306_s23, %s306_s23 }
   0xa   :  { %23 = vperm.xlu1 %298, %v15_v1   ;;  %33 = vperm.xlu0 %297, %v17_v4  }
   0xb   :  { %279 = vmatmul.mubr.msk.f32.gmra.mxu0 %vm41_vm0, %v18_v5  ;;  %p313_p3 = por %p312_p2, %p311_p1 }
   0xd   :  { %p314_p4 = pnand %p313_p3, %p307_p0 }
   0xe   :  { %299 = vset.pattern.permute.xlu0 %v331_v8 }
   0xf   :  { %144 = vperm.xlu0 %299, %v19_v7  }
  0x81   :  { %v29_v9 = vpop.permute.xlu1 %28  ;;  %v39_v10 = vpop.permute.xlu0 %38 }
  0x85   :  { %v24_v14 = vpop.permute.xlu1 %23  ;;  %v34_v16 = vpop.permute.xlu0 %33 }
  0x8a   :  { %v145_v25 = vpop.permute.xlu0 %144 }
  0xc7   :  { %v277_v11 = vpop.f32.mrf.mxu0 }
  0xc8   :  { %v125_v18 = vadd.f32 %v277_v11, %v29_v9 }
  0xc9   :  { %v119_v12 = vpop.f32.mrf.mxu0 }
  0xca   :  { %v120_v21 = vadd.f32 %v119_v12, %v24_v14  ;;  %v139_v23 = vmax.f32 %v125_v18, 0.0 }
  0xcb   :  { %v280_v13 = vpop.f32.mrf.mxu0 }
  0xcc   :  { %v135_v15 = vadd.f32 %v280_v13, %v39_v10  ;;  %v138_v24 = vmax.f32 %v120_v21, 0.0 }
  0xcd   :  { %v129_v17 = vpop.f32.mrf.mxu0 }
  0xce   :  { %v141_v19 = vmax.f32 %v135_v15, 0.0  ;;  %v130_v20 = vadd.f32 %v129_v17, %v34_v16 }
  0xd0   :  { %v140_v22 = vmax.f32 %v130_v20, 0.0  ;;  %282 = vmatpush3.msra.mxu1 %v141_v19 }
  0xd1   :  { %283 = vmatprep.subr.mxu1 %v329_v6 }
  0xd2   :  { %284 = vmatpush3.msra.mxu1 %v140_v22 }
  0xd3   :  { %285 = vmatprep.subr.mxu1 %v329_v6 }
  0xd4   :  { %286 = vmatpush3.msra.mxu1 %v139_v23 }
  0xd5   :  { %287 = vmatprep.subr.mxu1 %v329_v6 }
  0xd6   :  { %288 = vmatpush3.msra.mxu1 %v138_v24 }
  0xd7   :  { %290 = vmatmul.mubr.msk.f32.vlgmr.msra.gmra.mxu1 %vm147_vm2, %v19_v7 }
 0x197   :  { %v216_v26 = vpop.f32.mrf.mxu1 }
 0x198   :  { %v217_v27 = vadd.f32 %v216_v26, %v145_v25 }
 0x199   :  { %v291_v28 = vpop.f32.mrf.mxu1 }
 0x19a   :  { %v223_v29 = vand.u32 2147483647, %v217_v27  ;;  %v222_v43 = vmax.f32 %v217_v27, 0.0 }
 0x19c   :  { %v224_v30 = vsub.f32 0.0, %v223_v29 }
 0x19e   :  { %v225_v31 = vmul.f32 1.442695, %v224_v30 }
 0x1a0   :  { %300 = vpow2.f32 %v225_v31 }
 0x1ad   :  { %v301_v32 = vpop.eup %300 }
 0x1ae   :  { %v227_v33 = vadd.f32 1.0, %v301_v32  ;;  %v230_v34 = vmul.f32 -0.5, %v301_v32  ;;  %v233_v37 = vand.u32 2147483647, %v301_v32 }
 0x1b0   :  { %302 = vlog2.f32 %v227_v33  ;;  %v231_v36 = vadd.f32 1.0, %v230_v34  ;;  %vm234_vm3 = vcmp.lt.f32.partialorder %v233_v37, 0.0004427343 }
 0x1b1   :  { %304 = vtanh.f32 %v217_v27 }
 0x1b2   :  { %v232_v42 = vmul.f32 %v301_v32, %v231_v36 }
 0x1bd   :  { %v303_v39 = vpop.eup %302 }
 0x1be   :  { %v305_v40 = vpop.eup %304  ;;  %v229_v41 = vmul.f32 0.6931472, %v303_v39 }
 0x1bf   :  { %v221_v46 = vmul.f32 2.0, %v305_v40 }
 0x1c0   :  { %v235_v44 = vsel %vm234_vm3, %v232_v42, %v229_v41 }
 0x1c1   :  { %v236_v45 = vadd.f32 %v235_v44, %v222_v43 }
 0x1c3   :  { %v240_v47 = vsel %vm239_vm4, %v221_v46, %v236_v45 }
 0x1c4   :  { %242 = vst.msk [vmem:[#allocation2] sm:$0xf] %vm241_vm5, %v240_v47 }
 0x1c5   :  { %317 = shalt.err (!%p314_p4)
}
 0x1c6   :  { %252 = dma.vmem_to_hbm [thread:$0]  %s250_s2, 64, %s383_s3, [#allocation3]  }
 0x1c7   :  { %326 = dma.done.wait [#allocation3], 64  }
 0x1c8   :  { %327 = vsyncadd [#allocation3], 4294967232 }
 0x1c9   :  { %256 = vsyncpa [#allocation3], 1 }

</bundles_post_ra>
